<compile_context>
chip_gen: v7x
topology: tpu7x:2x2x1
jax: 0.10.0
libtpu: 0.0.40
codegen_flags: <defaults>
</compile_context>

<pallas_src>
import jax
import jax.numpy as jnp
import numpy as np
from jax.experimental import pallas as pl
from jax.experimental.pallas import tpu as pltpu

OUT_LANES = 128  # lane-dense output width (decoded | guess | kl | zero pad)


def _const_spec(shape):
    """Full-array block revisited by every grid step (weights stay resident)."""
    n = len(shape)
    return pl.BlockSpec(shape, lambda g: (0,) * n)


# ----------------------------------------------------------------------------
# Fused kernel factory: one program = B_blk sequences end-to-end
# (LSTM recurrence -> encoder -> reparameterize -> KL -> decoder -> adversary).
# ----------------------------------------------------------------------------
def make_fused_vae_kernel(T, B_blk, H, L, D, F):
    H3 = 3 * H

    def kernel(x_ref, eps_ref,
               wih_ref, whh_ref, blstm_ref,
               w1_ref, b1_ref, w2_ref, b2_ref,
               w3a_ref, b3a_ref, w4a_ref, b4a_ref,
               out_ref):
        # ---- path_encoder LSTM (batched over B_blk sequences, rows t-major) --
        # Hoisted input projection: one (R, D) x (D, 4H) matmul for all steps.
        pre = (jnp.dot(x_ref[...], wih_ref[...],
                       preferred_element_type=jnp.float32) + blstm_ref[...])
        whh = whh_ref[...]                                   # hoisted weight read

        h = jnp.zeros((B_blk, H), jnp.float32)
        c = jnp.zeros((B_blk, H), jnp.float32)
        hs = []
        for t in range(T):                 # static unroll; static value slices
            gates = pre[t * B_blk:(t + 1) * B_blk, :] + jnp.dot(
                h, whh, preferred_element_type=jnp.float32)  # (B_blk, 4H)
            # gate columns pre-reordered in the wrapper to [i | f | o | g]
            sig = jax.nn.sigmoid(gates[:, :H3])
            g_g = jnp.tanh(gates[:, H3:])
            c = sig[:, H:2 * H] * c + sig[:, :H] * g_g
            h = sig[:, 2 * H:H3] * jnp.tanh(c)
            hs.append(h)
        rnn = jnp.concatenate(hs, axis=0)                    # (R, H), t-major

        # ---- encoder + reparameterize + KL ----
        h1 = jnp.maximum(
            jnp.dot(rnn, w1_ref[...], preferred_element_type=jnp.float32)
            + b1_ref[...], 0.0)
        ml = (jnp.dot(h1, w2_ref[...], preferred_element_type=jnp.float32)
              + b2_ref[...])                                 # fc21 || fc22
        mu = ml[:, :L]
        logvar = ml[:, L:]
        std = jnp.exp(0.5 * logvar)
        z = mu + eps_ref[...] * std
        var = jnp.exp(logvar)
        kl = 0.5 * jnp.sum(var + mu * mu - logvar - 1.0,
                           axis=-1, keepdims=True)           # (R, 1)

        # ---- decoder + adversary ----
        # shared-input matmul: z @ [fc3 | adv1]
        h3a = jnp.maximum(
            jnp.dot(z, w3a_ref[...], preferred_element_type=jnp.float32)
            + b3a_ref[...], 0.0)
        # block-diagonal [fc4 | adv2], lane-padded to 128 -> decoded || guess || 0
        dg = (jnp.dot(h3a, w4a_ref[...], preferred_element_type=jnp.float32)
              + b4a_ref[...])                                # (R, 128)

        # insert kl at lane D+F; one unmasked lane-dense store.
        lane = jax.lax.broadcasted_iota(jnp.int32, dg.shape, 1)
        out_ref[...] = jnp.where(lane == D + F, kl, dg)

    return kernel


# ----------------------------------------------------------------------------
# Wrapper: weight prep (transpose / gate reorder / merges) + pallas_call + split.
# ----------------------------------------------------------------------------
def seq_adversarial_vae_forward(x, eps, p, *, num_blocks=1):
    B, T, D = x.shape
    H = p["lstm_w_hh"].shape[1]
    Hd = p["fc1_w"].shape[0]
    L = p["fc21_w"].shape[0]
    F = p["adv2_w"].shape[0]
    assert D + F + 1 <= OUT_LANES

    G = num_blocks                       # use 2 on v7x (2 TensorCores), 1 otherwise
    assert B % G == 0, "num_blocks must divide batch"
    B_blk = B // G
    R = B_blk * T
    assert G == 1 or R % 8 == 0, "rows per program must be a multiple of 8 when grid > 1"

    def reorder_gates(w):   # PyTorch [i,f,g,o] -> kernel [i,f,o,g] along axis 0
        return jnp.concatenate([w[:H], w[H:2 * H], w[3 * H:], w[2 * H:3 * H]], axis=0)

    wt = jnp.transpose                   # (out, in) -> (in, out)
    bb = lambda b: b.reshape(1, -1)

    wih_t = wt(reorder_gates(p["lstm_w_ih"]))                          # (D, 4H)
    whh_t = wt(reorder_gates(p["lstm_w_hh"]))                          # (H, 4H)
    b_lstm = reorder_gates(p["lstm_b_ih"] + p["lstm_b_hh"]).reshape(1, 4 * H)

    w1, b1 = wt(p["fc1_w"]), bb(p["fc1_b"])
    w2 = jnp.concatenate([wt(p["fc21_w"]), wt(p["fc22_w"])], axis=1)   # (Hd, 2L)
    b2 = jnp.concatenate([p["fc21_b"], p["fc22_b"]]).reshape(1, -1)
    w3a = jnp.concatenate([wt(p["fc3_w"]), wt(p["adv1_w"])], axis=1)   # (L, Hd+2L)
    b3a = jnp.concatenate([p["fc3_b"], p["adv1_b"]]).reshape(1, -1)

    # block-diagonal fc4 || adv2, lane-padded to 128 columns (exact zeros in pad)
    w4a = jnp.zeros((Hd + 2 * L, OUT_LANES), jnp.float32)
    w4a = w4a.at[:Hd, :D].set(wt(p["fc4_w"]))
    w4a = w4a.at[Hd:, D:D + F].set(wt(p["adv2_w"]))
    b4a = jnp.zeros((1, OUT_LANES), jnp.float32)
    b4a = b4a.at[0, :D].set(p["fc4_b"])
    b4a = b4a.at[0, D:D + F].set(p["adv2_b"])

    weights = (wih_t, whh_t, b_lstm, w1, b1, w2, b2, w3a, b3a, w4a, b4a)

    # tiny b-major -> t-major reorders so every in-kernel row access is contiguous
    x_k = x.reshape(G, B_blk, T, D).transpose(0, 2, 1, 3).reshape(G * R, D)
    eps_k = eps.reshape(G, B_blk, T, L).transpose(0, 2, 1, 3).reshape(G * R, L)

    kernel = make_fused_vae_kernel(T, B_blk, H, L, D, F)

    in_specs = [
        pl.BlockSpec((R, D), lambda g: (g, 0)),      # this program's x rows
        pl.BlockSpec((R, L), lambda g: (g, 0)),      # this program's eps rows
    ] + [_const_spec(w.shape) for w in weights]      # weights resident in VMEM

    out = pl.pallas_call(
        kernel,
        out_shape=jax.ShapeDtypeStruct((G * R, OUT_LANES), jnp.float32),
        grid=(G,),
        in_specs=in_specs,
        out_specs=pl.BlockSpec((R, OUT_LANES), lambda g: (g, 0)),
        compiler_params=pltpu.CompilerParams(dimension_semantics=("parallel",)),
    )(x_k, eps_k, *weights)

    # t-major -> b-major and split the packed lanes
    out3 = (out.reshape(G, T, B_blk, OUT_LANES)
               .transpose(0, 2, 1, 3)
               .reshape(B, T, OUT_LANES))
    decoded = out3[..., :D]                          # (B, T, D)
    guess = out3[..., D:D + F].reshape(B * T, F)     # (B*T, F)
    kl = out3[..., D + F]                            # (B, T)
    return decoded, guess, kl


# ----------------------------------------------------------------------------
# Pure-JAX reference (for correctness check)
# ----------------------------------------------------------------------------
def reference_forward(x, eps, p):
    B, T, D = x.shape
    H = p["lstm_w_hh"].shape[1]

    def step(carry, x_t):
        h, c = carry
        gates = (x_t @ p["lstm_w_ih"].T + h @ p["lstm_w_hh"].T
                 + p["lstm_b_ih"] + p["lstm_b_hh"])
        i, f, g, o = jnp.split(gates, 4, axis=-1)
        c = jax.nn.sigmoid(f) * c + jax.nn.sigmoid(i) * jnp.tanh(g)
        h = jax.nn.sigmoid(o) * jnp.tanh(c)
        return (h, c), h

    xs = jnp.transpose(x, (1, 0, 2))
    (_, _), hs = jax.lax.scan(
        step, (jnp.zeros((B, H), jnp.float32), jnp.zeros((B, H), jnp.float32)), xs)
    rnn_out = jnp.transpose(hs, (1, 0, 2)).reshape(B * T, H)

    h1 = jax.nn.relu(rnn_out @ p["fc1_w"].T + p["fc1_b"])
    mu = h1 @ p["fc21_w"].T + p["fc21_b"]
    logvar = h1 @ p["fc22_w"].T + p["fc22_b"]
    z = mu + eps * jnp.exp(0.5 * logvar)
    var = jnp.exp(logvar)
    kl = 0.5 * (var + mu ** 2 - logvar - 1.0)
    kl = kl.reshape(B, T, -1).sum(axis=-1)
    h3 = jax.nn.relu(z @ p["fc3_w"].T + p["fc3_b"])
    decoded = (h3 @ p["fc4_w"].T + p["fc4_b"]).reshape(B, T, D)
    ha = jax.nn.relu(z @ p["adv1_w"].T + p["adv1_b"])
    guess = ha @ p["adv2_w"].T + p["adv2_b"]
    return decoded, guess, kl


# ----------------------------------------------------------------------------
# Deterministic parameter init (PyTorch-style uniform fan-in scaling)
# ----------------------------------------------------------------------------
def init_params(key, input_size, latent_size, hidden_size, num_feat, rnn_hidden):
    ks = jax.random.split(key, 20)

    def unif(k, shape, fan_in):
        bound = 1.0 / (fan_in ** 0.5)
        return jax.random.uniform(k, shape, jnp.float32, -bound, bound)

    p = {}
    p["lstm_w_ih"] = unif(ks[0], (4 * rnn_hidden, input_size), rnn_hidden)
    p["lstm_w_hh"] = unif(ks[1], (4 * rnn_hidden, rnn_hidden), rnn_hidden)
    p["lstm_b_ih"] = unif(ks[2], (4 * rnn_hidden,), rnn_hidden)
    p["lstm_b_hh"] = unif(ks[3], (4 * rnn_hidden,), rnn_hidden)
    p["fc1_w"] = unif(ks[4], (hidden_size, rnn_hidden), rnn_hidden)
    p["fc1_b"] = unif(ks[5], (hidden_size,), rnn_hidden)
    p["fc21_w"] = unif(ks[6], (latent_size, hidden_size), hidden_size)
    p["fc21_b"] = unif(ks[7], (latent_size,), hidden_size)
    p["fc22_w"] = unif(ks[8], (latent_size, hidden_size), hidden_size)
    p["fc22_b"] = unif(ks[9], (latent_size,), hidden_size)
    p["fc3_w"] = unif(ks[10], (hidden_size, latent_size), latent_size)
    p["fc3_b"] = unif(ks[11], (hidden_size,), latent_size)
    p["fc4_w"] = unif(ks[12], (input_size, hidden_size), hidden_size)
    p["fc4_b"] = unif(ks[13], (input_size,), hidden_size)
    p["adv1_w"] = unif(ks[14], (2 * latent_size, latent_size), latent_size)
    p["adv1_b"] = unif(ks[15], (2 * latent_size,), latent_size)
    p["adv2_w"] = unif(ks[16], (num_feat, 2 * latent_size), 2 * latent_size)
    p["adv2_b"] = unif(ks[17], (num_feat,), 2 * latent_size)
    return p


if __name__ == "__main__":
    B, T = 2, 8
    input_size, latent_size, hidden_size = 8, 8, 32
    num_features_to_guess, rnn_hidden_size = 4, 32

    key = jax.random.PRNGKey(0)
    k_x, k_eps, k_p = jax.random.split(key, 3)
    x = jax.random.normal(k_x, (B, T, input_size), jnp.float32)
    eps = jax.random.normal(k_eps, (B * T, latent_size), jnp.float32)
    params = init_params(k_p, input_size, latent_size, hidden_size,
                         num_features_to_guess, rnn_hidden_size)

    decoded, guess, kl = seq_adversarial_vae_forward(x, eps, params, num_blocks=1)
    jax.block_until_ready((decoded, guess, kl))

    dec_ref, guess_ref, kl_ref = reference_forward(x, eps, params)
    assert decoded.shape == (B, T, input_size)
    assert guess.shape == (B * T, num_features_to_guess)
    assert kl.shape == (B, T)
    np.testing.assert_allclose(np.asarray(decoded), np.asarray(dec_ref), atol=2e-3, rtol=2e-3)
    np.testing.assert_allclose(np.asarray(guess), np.asarray(guess_ref), atol=2e-3, rtol=2e-3)
    np.testing.assert_allclose(np.asarray(kl), np.asarray(kl_ref), atol=2e-3, rtol=2e-3)

    print("KERNEL_OK")
</pallas_src>

<mosaic_0001>
module attributes {stable_mosaic.version = 11 : i64} {
  func.func @kernel(%arg0: i32, %arg1: memref<16x8xf32, #tpu.memory_space<vmem>>, %arg2: memref<16x8xf32, #tpu.memory_space<vmem>>, %arg3: memref<8x128xf32, #tpu.memory_space<vmem>>, %arg4: memref<32x128xf32, #tpu.memory_space<vmem>>, %arg5: memref<1x128xf32, #tpu.memory_space<vmem>>, %arg6: memref<32x32xf32, #tpu.memory_space<vmem>>, %arg7: memref<1x32xf32, #tpu.memory_space<vmem>>, %arg8: memref<32x16xf32, #tpu.memory_space<vmem>>, %arg9: memref<1x16xf32, #tpu.memory_space<vmem>>, %arg10: memref<8x48xf32, #tpu.memory_space<vmem>>, %arg11: memref<1x48xf32, #tpu.memory_space<vmem>>, %arg12: memref<48x128xf32, #tpu.memory_space<vmem>>, %arg13: memref<1x128xf32, #tpu.memory_space<vmem>>, %arg14: memref<16x128xf32, #tpu.memory_space<vmem>>) attributes {dimension_semantics = [#tpu.dimension_semantics<parallel>], iteration_bounds = array<i64: 1>, scalar_prefetch = 0 : i64, scratch_operands = 0 : i64, tpu.core_type = #tpu.core_type<tc>, window_params = [{transform_indices = @transform_0, window_bounds = array<i64: 16, 8>}, {transform_indices = @transform_1, window_bounds = array<i64: 16, 8>}, {pipeline_mode = #tpu.pipeline_mode<synchronous>, transform_indices = @transform_2, window_bounds = array<i64: 8, 128>}, {pipeline_mode = #tpu.pipeline_mode<synchronous>, transform_indices = @transform_3, window_bounds = array<i64: 32, 128>}, {pipeline_mode = #tpu.pipeline_mode<synchronous>, transform_indices = @transform_4, window_bounds = array<i64: 1, 128>}, {pipeline_mode = #tpu.pipeline_mode<synchronous>, transform_indices = @transform_5, window_bounds = array<i64: 32, 32>}, {pipeline_mode = #tpu.pipeline_mode<synchronous>, transform_indices = @transform_6, window_bounds = array<i64: 1, 32>}, {pipeline_mode = #tpu.pipeline_mode<synchronous>, transform_indices = @transform_7, window_bounds = array<i64: 32, 16>}, {pipeline_mode = #tpu.pipeline_mode<synchronous>, transform_indices = @transform_8, window_bounds = array<i64: 1, 16>}, {pipeline_mode = #tpu.pipeline_mode<synchronous>, transform_indices = @transform_9, window_bounds = array<i64: 8, 48>}, {pipeline_mode = #tpu.pipeline_mode<synchronous>, transform_indices = @transform_10, window_bounds = array<i64: 1, 48>}, {pipeline_mode = #tpu.pipeline_mode<synchronous>, transform_indices = @transform_11, window_bounds = array<i64: 48, 128>}, {pipeline_mode = #tpu.pipeline_mode<synchronous>, transform_indices = @transform_12, window_bounds = array<i64: 1, 128>}, {transform_indices = @transform_13, window_bounds = array<i64: 16, 128>}]} {
    %c0 = arith.constant 0 : index
    %c0_0 = arith.constant 0 : index
    %0 = vector.load %arg1[%c0, %c0_0] : memref<16x8xf32, #tpu.memory_space<vmem>>, vector<16x8xf32>
    %c0_1 = arith.constant 0 : index
    %c0_2 = arith.constant 0 : index
    %1 = vector.load %arg3[%c0_1, %c0_2] : memref<8x128xf32, #tpu.memory_space<vmem>>, vector<8x128xf32>
    %cst = arith.constant dense<0.000000e+00> : vector<16x128xf32>
    %2 = tpu.matmul %0, %1, %cst {dimension_numbers = #tpu.dot_dimension_numbers<[1], [0], [0], [1], [0, 0, 1, 1], [], []>} : vector<16x8xf32>, vector<8x128xf32>, vector<16x128xf32> -> vector<16x128xf32>
    %c0_3 = arith.constant 0 : index
    %c0_4 = arith.constant 0 : index
    %3 = vector.load %arg5[%c0_3, %c0_4] : memref<1x128xf32, #tpu.memory_space<vmem>>, vector<1x128xf32>
    %4 = vector.broadcast %3 : vector<1x128xf32> to vector<16x128xf32>
    %5 = arith.addf %2, %4 : vector<16x128xf32>
    %c0_5 = arith.constant 0 : index
    %c0_6 = arith.constant 0 : index
    %6 = vector.load %arg4[%c0_5, %c0_6] : memref<32x128xf32, #tpu.memory_space<vmem>>, vector<32x128xf32>
    %cst_7 = arith.constant 0.000000e+00 : f32
    %7 = vector.broadcast %cst_7 : f32 to vector<2x32xf32>
    %cst_8 = arith.constant 0.000000e+00 : f32
    %8 = vector.broadcast %cst_8 : f32 to vector<2x32xf32>
    %9 = vector.extract_strided_slice %5 {offsets = [0, 0], sizes = [2, 128], strides = [1, 1]} : vector<16x128xf32> to vector<2x128xf32>
    %cst_9 = arith.constant dense<0.000000e+00> : vector<2x128xf32>
    %10 = tpu.matmul %7, %6, %cst_9 {dimension_numbers = #tpu.dot_dimension_numbers<[1], [0], [0], [1], [0, 0, 1, 1], [], []>} : vector<2x32xf32>, vector<32x128xf32>, vector<2x128xf32> -> vector<2x128xf32>
    %11 = arith.addf %9, %10 : vector<2x128xf32>
    %12 = vector.extract_strided_slice %11 {offsets = [0, 0], sizes = [2, 96], strides = [1, 1]} : vector<2x128xf32> to vector<2x96xf32>
    %13 = arith.negf %12 : vector<2x96xf32>
    %14 = math.exp %13 : vector<2x96xf32>
    %cst_10 = arith.constant 1.000000e+00 : f32
    %15 = vector.broadcast %cst_10 : f32 to vector<2x96xf32>
    %16 = arith.addf %15, %14 : vector<2x96xf32>
    %17 = arith.divf %15, %16 : vector<2x96xf32>
    %18 = vector.extract_strided_slice %11 {offsets = [0, 96], sizes = [2, 32], strides = [1, 1]} : vector<2x128xf32> to vector<2x32xf32>
    %19 = math.tanh %18 : vector<2x32xf32>
    %20 = vector.extract_strided_slice %17 {offsets = [0, 32], sizes = [2, 32], strides = [1, 1]} : vector<2x96xf32> to vector<2x32xf32>
    %21 = arith.mulf %20, %8 : vector<2x32xf32>
    %22 = vector.extract_strided_slice %17 {offsets = [0, 0], sizes = [2, 32], strides = [1, 1]} : vector<2x96xf32> to vector<2x32xf32>
    %23 = arith.mulf %22, %19 : vector<2x32xf32>
    %24 = arith.addf %21, %23 : vector<2x32xf32>
    %25 = vector.extract_strided_slice %17 {offsets = [0, 64], sizes = [2, 32], strides = [1, 1]} : vector<2x96xf32> to vector<2x32xf32>
    %26 = math.tanh %24 : vector<2x32xf32>
    %27 = arith.mulf %25, %26 : vector<2x32xf32>
    %28 = vector.extract_strided_slice %5 {offsets = [2, 0], sizes = [2, 128], strides = [1, 1]} : vector<16x128xf32> to vector<2x128xf32>
    %cst_11 = arith.constant dense<0.000000e+00> : vector<2x128xf32>
    %29 = tpu.matmul %27, %6, %cst_11 {dimension_numbers = #tpu.dot_dimension_numbers<[1], [0], [0], [1], [0, 0, 1, 1], [], []>} : vector<2x32xf32>, vector<32x128xf32>, vector<2x128xf32> -> vector<2x128xf32>
    %30 = arith.addf %28, %29 : vector<2x128xf32>
    %31 = vector.extract_strided_slice %30 {offsets = [0, 0], sizes = [2, 96], strides = [1, 1]} : vector<2x128xf32> to vector<2x96xf32>
    %32 = arith.negf %31 : vector<2x96xf32>
    %33 = math.exp %32 : vector<2x96xf32>
    %cst_12 = arith.constant 1.000000e+00 : f32
    %34 = vector.broadcast %cst_12 : f32 to vector<2x96xf32>
    %35 = arith.addf %34, %33 : vector<2x96xf32>
    %36 = arith.divf %34, %35 : vector<2x96xf32>
    %37 = vector.extract_strided_slice %30 {offsets = [0, 96], sizes = [2, 32], strides = [1, 1]} : vector<2x128xf32> to vector<2x32xf32>
    %38 = math.tanh %37 : vector<2x32xf32>
    %39 = vector.extract_strided_slice %36 {offsets = [0, 32], sizes = [2, 32], strides = [1, 1]} : vector<2x96xf32> to vector<2x32xf32>
    %40 = arith.mulf %39, %24 : vector<2x32xf32>
    %41 = vector.extract_strided_slice %36 {offsets = [0, 0], sizes = [2, 32], strides = [1, 1]} : vector<2x96xf32> to vector<2x32xf32>
    %42 = arith.mulf %41, %38 : vector<2x32xf32>
    %43 = arith.addf %40, %42 : vector<2x32xf32>
    %44 = vector.extract_strided_slice %36 {offsets = [0, 64], sizes = [2, 32], strides = [1, 1]} : vector<2x96xf32> to vector<2x32xf32>
    %45 = math.tanh %43 : vector<2x32xf32>
    %46 = arith.mulf %44, %45 : vector<2x32xf32>
    %47 = vector.extract_strided_slice %5 {offsets = [4, 0], sizes = [2, 128], strides = [1, 1]} : vector<16x128xf32> to vector<2x128xf32>
    %cst_13 = arith.constant dense<0.000000e+00> : vector<2x128xf32>
    %48 = tpu.matmul %46, %6, %cst_13 {dimension_numbers = #tpu.dot_dimension_numbers<[1], [0], [0], [1], [0, 0, 1, 1], [], []>} : vector<2x32xf32>, vector<32x128xf32>, vector<2x128xf32> -> vector<2x128xf32>
    %49 = arith.addf %47, %48 : vector<2x128xf32>
    %50 = vector.extract_strided_slice %49 {offsets = [0, 0], sizes = [2, 96], strides = [1, 1]} : vector<2x128xf32> to vector<2x96xf32>
    %51 = arith.negf %50 : vector<2x96xf32>
    %52 = math.exp %51 : vector<2x96xf32>
    %cst_14 = arith.constant 1.000000e+00 : f32
    %53 = vector.broadcast %cst_14 : f32 to vector<2x96xf32>
    %54 = arith.addf %53, %52 : vector<2x96xf32>
    %55 = arith.divf %53, %54 : vector<2x96xf32>
    %56 = vector.extract_strided_slice %49 {offsets = [0, 96], sizes = [2, 32], strides = [1, 1]} : vector<2x128xf32> to vector<2x32xf32>
    %57 = math.tanh %56 : vector<2x32xf32>
    %58 = vector.extract_strided_slice %55 {offsets = [0, 32], sizes = [2, 32], strides = [1, 1]} : vector<2x96xf32> to vector<2x32xf32>
    %59 = arith.mulf %58, %43 : vector<2x32xf32>
    %60 = vector.extract_strided_slice %55 {offsets = [0, 0], sizes = [2, 32], strides = [1, 1]} : vector<2x96xf32> to vector<2x32xf32>
    %61 = arith.mulf %60, %57 : vector<2x32xf32>
    %62 = arith.addf %59, %61 : vector<2x32xf32>
    %63 = vector.extract_strided_slice %55 {offsets = [0, 64], sizes = [2, 32], strides = [1, 1]} : vector<2x96xf32> to vector<2x32xf32>
    %64 = math.tanh %62 : vector<2x32xf32>
    %65 = arith.mulf %63, %64 : vector<2x32xf32>
    %66 = vector.extract_strided_slice %5 {offsets = [6, 0], sizes = [2, 128], strides = [1, 1]} : vector<16x128xf32> to vector<2x128xf32>
    %cst_15 = arith.constant dense<0.000000e+00> : vector<2x128xf32>
    %67 = tpu.matmul %65, %6, %cst_15 {dimension_numbers = #tpu.dot_dimension_numbers<[1], [0], [0], [1], [0, 0, 1, 1], [], []>} : vector<2x32xf32>, vector<32x128xf32>, vector<2x128xf32> -> vector<2x128xf32>
    %68 = arith.addf %66, %67 : vector<2x128xf32>
    %69 = vector.extract_strided_slice %68 {offsets = [0, 0], sizes = [2, 96], strides = [1, 1]} : vector<2x128xf32> to vector<2x96xf32>
    %70 = arith.negf %69 : vector<2x96xf32>
    %71 = math.exp %70 : vector<2x96xf32>
    %cst_16 = arith.constant 1.000000e+00 : f32
    %72 = vector.broadcast %cst_16 : f32 to vector<2x96xf32>
    %73 = arith.addf %72, %71 : vector<2x96xf32>
    %74 = arith.divf %72, %73 : vector<2x96xf32>
    %75 = vector.extract_strided_slice %68 {offsets = [0, 96], sizes = [2, 32], strides = [1, 1]} : vector<2x128xf32> to vector<2x32xf32>
    %76 = math.tanh %75 : vector<2x32xf32>
    %77 = vector.extract_strided_slice %74 {offsets = [0, 32], sizes = [2, 32], strides = [1, 1]} : vector<2x96xf32> to vector<2x32xf32>
    %78 = arith.mulf %77, %62 : vector<2x32xf32>
    %79 = vector.extract_strided_slice %74 {offsets = [0, 0], sizes = [2, 32], strides = [1, 1]} : vector<2x96xf32> to vector<2x32xf32>
    %80 = arith.mulf %79, %76 : vector<2x32xf32>
    %81 = arith.addf %78, %80 : vector<2x32xf32>
    %82 = vector.extract_strided_slice %74 {offsets = [0, 64], sizes = [2, 32], strides = [1, 1]} : vector<2x96xf32> to vector<2x32xf32>
    %83 = math.tanh %81 : vector<2x32xf32>
    %84 = arith.mulf %82, %83 : vector<2x32xf32>
    %85 = vector.extract_strided_slice %5 {offsets = [8, 0], sizes = [2, 128], strides = [1, 1]} : vector<16x128xf32> to vector<2x128xf32>
    %cst_17 = arith.constant dense<0.000000e+00> : vector<2x128xf32>
    %86 = tpu.matmul %84, %6, %cst_17 {dimension_numbers = #tpu.dot_dimension_numbers<[1], [0], [0], [1], [0, 0, 1, 1], [], []>} : vector<2x32xf32>, vector<32x128xf32>, vector<2x128xf32> -> vector<2x128xf32>
    %87 = arith.addf %85, %86 : vector<2x128xf32>
    %88 = vector.extract_strided_slice %87 {offsets = [0, 0], sizes = [2, 96], strides = [1, 1]} : vector<2x128xf32> to vector<2x96xf32>
    %89 = arith.negf %88 : vector<2x96xf32>
    %90 = math.exp %89 : vector<2x96xf32>
    %cst_18 = arith.constant 1.000000e+00 : f32
    %91 = vector.broadcast %cst_18 : f32 to vector<2x96xf32>
    %92 = arith.addf %91, %90 : vector<2x96xf32>
    %93 = arith.divf %91, %92 : vector<2x96xf32>
    %94 = vector.extract_strided_slice %87 {offsets = [0, 96], sizes = [2, 32], strides = [1, 1]} : vector<2x128xf32> to vector<2x32xf32>
    %95 = math.tanh %94 : vector<2x32xf32>
    %96 = vector.extract_strided_slice %93 {offsets = [0, 32], sizes = [2, 32], strides = [1, 1]} : vector<2x96xf32> to vector<2x32xf32>
    %97 = arith.mulf %96, %81 : vector<2x32xf32>
    %98 = vector.extract_strided_slice %93 {offsets = [0, 0], sizes = [2, 32], strides = [1, 1]} : vector<2x96xf32> to vector<2x32xf32>
    %99 = arith.mulf %98, %95 : vector<2x32xf32>
    %100 = arith.addf %97, %99 : vector<2x32xf32>
    %101 = vector.extract_strided_slice %93 {offsets = [0, 64], sizes = [2, 32], strides = [1, 1]} : vector<2x96xf32> to vector<2x32xf32>
    %102 = math.tanh %100 : vector<2x32xf32>
    %103 = arith.mulf %101, %102 : vector<2x32xf32>
    %104 = vector.extract_strided_slice %5 {offsets = [10, 0], sizes = [2, 128], strides = [1, 1]} : vector<16x128xf32> to vector<2x128xf32>
    %cst_19 = arith.constant dense<0.000000e+00> : vector<2x128xf32>
    %105 = tpu.matmul %103, %6, %cst_19 {dimension_numbers = #tpu.dot_dimension_numbers<[1], [0], [0], [1], [0, 0, 1, 1], [], []>} : vector<2x32xf32>, vector<32x128xf32>, vector<2x128xf32> -> vector<2x128xf32>
    %106 = arith.addf %104, %105 : vector<2x128xf32>
    %107 = vector.extract_strided_slice %106 {offsets = [0, 0], sizes = [2, 96], strides = [1, 1]} : vector<2x128xf32> to vector<2x96xf32>
    %108 = arith.negf %107 : vector<2x96xf32>
    %109 = math.exp %108 : vector<2x96xf32>
    %cst_20 = arith.constant 1.000000e+00 : f32
    %110 = vector.broadcast %cst_20 : f32 to vector<2x96xf32>
    %111 = arith.addf %110, %109 : vector<2x96xf32>
    %112 = arith.divf %110, %111 : vector<2x96xf32>
    %113 = vector.extract_strided_slice %106 {offsets = [0, 96], sizes = [2, 32], strides = [1, 1]} : vector<2x128xf32> to vector<2x32xf32>
    %114 = math.tanh %113 : vector<2x32xf32>
    %115 = vector.extract_strided_slice %112 {offsets = [0, 32], sizes = [2, 32], strides = [1, 1]} : vector<2x96xf32> to vector<2x32xf32>
    %116 = arith.mulf %115, %100 : vector<2x32xf32>
    %117 = vector.extract_strided_slice %112 {offsets = [0, 0], sizes = [2, 32], strides = [1, 1]} : vector<2x96xf32> to vector<2x32xf32>
    %118 = arith.mulf %117, %114 : vector<2x32xf32>
    %119 = arith.addf %116, %118 : vector<2x32xf32>
    %120 = vector.extract_strided_slice %112 {offsets = [0, 64], sizes = [2, 32], strides = [1, 1]} : vector<2x96xf32> to vector<2x32xf32>
    %121 = math.tanh %119 : vector<2x32xf32>
    %122 = arith.mulf %120, %121 : vector<2x32xf32>
    %123 = vector.extract_strided_slice %5 {offsets = [12, 0], sizes = [2, 128], strides = [1, 1]} : vector<16x128xf32> to vector<2x128xf32>
    %cst_21 = arith.constant dense<0.000000e+00> : vector<2x128xf32>
    %124 = tpu.matmul %122, %6, %cst_21 {dimension_numbers = #tpu.dot_dimension_numbers<[1], [0], [0], [1], [0, 0, 1, 1], [], []>} : vector<2x32xf32>, vector<32x128xf32>, vector<2x128xf32> -> vector<2x128xf32>
    %125 = arith.addf %123, %124 : vector<2x128xf32>
    %126 = vector.extract_strided_slice %125 {offsets = [0, 0], sizes = [2, 96], strides = [1, 1]} : vector<2x128xf32> to vector<2x96xf32>
    %127 = arith.negf %126 : vector<2x96xf32>
    %128 = math.exp %127 : vector<2x96xf32>
    %cst_22 = arith.constant 1.000000e+00 : f32
    %129 = vector.broadcast %cst_22 : f32 to vector<2x96xf32>
    %130 = arith.addf %129, %128 : vector<2x96xf32>
    %131 = arith.divf %129, %130 : vector<2x96xf32>
    %132 = vector.extract_strided_slice %125 {offsets = [0, 96], sizes = [2, 32], strides = [1, 1]} : vector<2x128xf32> to vector<2x32xf32>
    %133 = math.tanh %132 : vector<2x32xf32>
    %134 = vector.extract_strided_slice %131 {offsets = [0, 32], sizes = [2, 32], strides = [1, 1]} : vector<2x96xf32> to vector<2x32xf32>
    %135 = arith.mulf %134, %119 : vector<2x32xf32>
    %136 = vector.extract_strided_slice %131 {offsets = [0, 0], sizes = [2, 32], strides = [1, 1]} : vector<2x96xf32> to vector<2x32xf32>
    %137 = arith.mulf %136, %133 : vector<2x32xf32>
    %138 = arith.addf %135, %137 : vector<2x32xf32>
    %139 = vector.extract_strided_slice %131 {offsets = [0, 64], sizes = [2, 32], strides = [1, 1]} : vector<2x96xf32> to vector<2x32xf32>
    %140 = math.tanh %138 : vector<2x32xf32>
    %141 = arith.mulf %139, %140 : vector<2x32xf32>
    %142 = vector.extract_strided_slice %5 {offsets = [14, 0], sizes = [2, 128], strides = [1, 1]} : vector<16x128xf32> to vector<2x128xf32>
    %cst_23 = arith.constant dense<0.000000e+00> : vector<2x128xf32>
    %143 = tpu.matmul %141, %6, %cst_23 {dimension_numbers = #tpu.dot_dimension_numbers<[1], [0], [0], [1], [0, 0, 1, 1], [], []>} : vector<2x32xf32>, vector<32x128xf32>, vector<2x128xf32> -> vector<2x128xf32>
    %144 = arith.addf %142, %143 : vector<2x128xf32>
    %145 = vector.extract_strided_slice %144 {offsets = [0, 0], sizes = [2, 96], strides = [1, 1]} : vector<2x128xf32> to vector<2x96xf32>
    %146 = arith.negf %145 : vector<2x96xf32>
    %147 = math.exp %146 : vector<2x96xf32>
    %cst_24 = arith.constant 1.000000e+00 : f32
    %148 = vector.broadcast %cst_24 : f32 to vector<2x96xf32>
    %149 = arith.addf %148, %147 : vector<2x96xf32>
    %150 = arith.divf %148, %149 : vector<2x96xf32>
    %151 = vector.extract_strided_slice %144 {offsets = [0, 96], sizes = [2, 32], strides = [1, 1]} : vector<2x128xf32> to vector<2x32xf32>
    %152 = math.tanh %151 : vector<2x32xf32>
    %153 = vector.extract_strided_slice %150 {offsets = [0, 32], sizes = [2, 32], strides = [1, 1]} : vector<2x96xf32> to vector<2x32xf32>
    %154 = arith.mulf %153, %138 : vector<2x32xf32>
    %155 = vector.extract_strided_slice %150 {offsets = [0, 0], sizes = [2, 32], strides = [1, 1]} : vector<2x96xf32> to vector<2x32xf32>
    %156 = arith.mulf %155, %152 : vector<2x32xf32>
    %157 = arith.addf %154, %156 : vector<2x32xf32>
    %158 = vector.extract_strided_slice %150 {offsets = [0, 64], sizes = [2, 32], strides = [1, 1]} : vector<2x96xf32> to vector<2x32xf32>
    %159 = math.tanh %157 : vector<2x32xf32>
    %160 = arith.mulf %158, %159 : vector<2x32xf32>
    %161 = tpu.concatenate %27, %46, %65, %84, %103, %122, %141, %160 in 0 : vector<2x32xf32>, vector<2x32xf32>, vector<2x32xf32>, vector<2x32xf32>, vector<2x32xf32>, vector<2x32xf32>, vector<2x32xf32>, vector<2x32xf32> -> vector<16x32xf32>
    %c0_25 = arith.constant 0 : index
    %c0_26 = arith.constant 0 : index
    %162 = vector.load %arg6[%c0_25, %c0_26] : memref<32x32xf32, #tpu.memory_space<vmem>>, vector<32x32xf32>
    %cst_27 = arith.constant dense<0.000000e+00> : vector<16x32xf32>
    %163 = tpu.matmul %161, %162, %cst_27 {dimension_numbers = #tpu.dot_dimension_numbers<[1], [0], [0], [1], [0, 0, 1, 1], [], []>} : vector<16x32xf32>, vector<32x32xf32>, vector<16x32xf32> -> vector<16x32xf32>
    %c0_28 = arith.constant 0 : index
    %c0_29 = arith.constant 0 : index
    %164 = vector.load %arg7[%c0_28, %c0_29] : memref<1x32xf32, #tpu.memory_space<vmem>>, vector<1x32xf32>
    %165 = vector.broadcast %164 : vector<1x32xf32> to vector<16x32xf32>
    %166 = arith.addf %163, %165 : vector<16x32xf32>
    %cst_30 = arith.constant 0.000000e+00 : f32
    %167 = vector.broadcast %cst_30 : f32 to vector<16x32xf32>
    %168 = arith.maximumf %166, %167 : vector<16x32xf32>
    %c0_31 = arith.constant 0 : index
    %c0_32 = arith.constant 0 : index
    %169 = vector.load %arg8[%c0_31, %c0_32] : memref<32x16xf32, #tpu.memory_space<vmem>>, vector<32x16xf32>
    %cst_33 = arith.constant dense<0.000000e+00> : vector<16x16xf32>
    %170 = tpu.matmul %168, %169, %cst_33 {dimension_numbers = #tpu.dot_dimension_numbers<[1], [0], [0], [1], [0, 0, 1, 1], [], []>} : vector<16x32xf32>, vector<32x16xf32>, vector<16x16xf32> -> vector<16x16xf32>
    %c0_34 = arith.constant 0 : index
    %c0_35 = arith.constant 0 : index
    %171 = vector.load %arg9[%c0_34, %c0_35] : memref<1x16xf32, #tpu.memory_space<vmem>>, vector<1x16xf32>
    %172 = vector.broadcast %171 : vector<1x16xf32> to vector<16x16xf32>
    %173 = arith.addf %170, %172 : vector<16x16xf32>
    %174 = vector.extract_strided_slice %173 {offsets = [0, 0], sizes = [16, 8], strides = [1, 1]} : vector<16x16xf32> to vector<16x8xf32>
    %175 = vector.extract_strided_slice %173 {offsets = [0, 8], sizes = [16, 8], strides = [1, 1]} : vector<16x16xf32> to vector<16x8xf32>
    %cst_36 = arith.constant 5.000000e-01 : f32
    %176 = vector.broadcast %cst_36 : f32 to vector<16x8xf32>
    %177 = arith.mulf %176, %175 : vector<16x8xf32>
    %178 = math.exp %177 : vector<16x8xf32>
    %c0_37 = arith.constant 0 : index
    %c0_38 = arith.constant 0 : index
    %179 = vector.load %arg2[%c0_37, %c0_38] : memref<16x8xf32, #tpu.memory_space<vmem>>, vector<16x8xf32>
    %180 = arith.mulf %179, %178 : vector<16x8xf32>
    %181 = arith.addf %174, %180 : vector<16x8xf32>
    %182 = math.exp %175 : vector<16x8xf32>
    %183 = arith.mulf %174, %174 : vector<16x8xf32>
    %184 = arith.addf %182, %183 : vector<16x8xf32>
    %185 = arith.subf %184, %175 : vector<16x8xf32>
    %cst_39 = arith.constant 1.000000e+00 : f32
    %186 = vector.broadcast %cst_39 : f32 to vector<16x8xf32>
    %187 = arith.subf %185, %186 : vector<16x8xf32>
    %cst_40 = arith.constant dense<0.000000e+00> : vector<16xf32>
    %188 = vector.multi_reduction <add>, %187, %cst_40 [1] : vector<16x8xf32> to vector<16xf32>
    %189 = vector.shape_cast %188 : vector<16xf32> to vector<16x1xf32>
    %cst_41 = arith.constant 5.000000e-01 : f32
    %190 = vector.broadcast %cst_41 : f32 to vector<16x1xf32>
    %191 = arith.mulf %190, %189 : vector<16x1xf32>
    %c0_42 = arith.constant 0 : index
    %c0_43 = arith.constant 0 : index
    %192 = vector.load %arg10[%c0_42, %c0_43] : memref<8x48xf32, #tpu.memory_space<vmem>>, vector<8x48xf32>
    %cst_44 = arith.constant dense<0.000000e+00> : vector<16x48xf32>
    %193 = tpu.matmul %181, %192, %cst_44 {dimension_numbers = #tpu.dot_dimension_numbers<[1], [0], [0], [1], [0, 0, 1, 1], [], []>} : vector<16x8xf32>, vector<8x48xf32>, vector<16x48xf32> -> vector<16x48xf32>
    %c0_45 = arith.constant 0 : index
    %c0_46 = arith.constant 0 : index
    %194 = vector.load %arg11[%c0_45, %c0_46] : memref<1x48xf32, #tpu.memory_space<vmem>>, vector<1x48xf32>
    %195 = vector.broadcast %194 : vector<1x48xf32> to vector<16x48xf32>
    %196 = arith.addf %193, %195 : vector<16x48xf32>
    %cst_47 = arith.constant 0.000000e+00 : f32
    %197 = vector.broadcast %cst_47 : f32 to vector<16x48xf32>
    %198 = arith.maximumf %196, %197 : vector<16x48xf32>
    %c0_48 = arith.constant 0 : index
    %c0_49 = arith.constant 0 : index
    %199 = vector.load %arg12[%c0_48, %c0_49] : memref<48x128xf32, #tpu.memory_space<vmem>>, vector<48x128xf32>
    %cst_50 = arith.constant dense<0.000000e+00> : vector<16x128xf32>
    %200 = tpu.matmul %198, %199, %cst_50 {dimension_numbers = #tpu.dot_dimension_numbers<[1], [0], [0], [1], [0, 0, 1, 1], [], []>} : vector<16x48xf32>, vector<48x128xf32>, vector<16x128xf32> -> vector<16x128xf32>
    %c0_51 = arith.constant 0 : index
    %c0_52 = arith.constant 0 : index
    %201 = vector.load %arg13[%c0_51, %c0_52] : memref<1x128xf32, #tpu.memory_space<vmem>>, vector<1x128xf32>
    %202 = vector.broadcast %201 : vector<1x128xf32> to vector<16x128xf32>
    %203 = arith.addf %200, %202 : vector<16x128xf32>
    %204 = tpu.iota {dimensions = array<i32: 1>} : vector<16x128xi32>
    %c12_i32 = arith.constant 12 : i32
    %205 = vector.broadcast %c12_i32 : i32 to vector<16x128xi32>
    %206 = arith.cmpi eq, %204, %205 : vector<16x128xi32>
    %207 = vector.shape_cast %191 : vector<16x1xf32> to vector<16x1xf32>
    %208 = vector.broadcast %207 : vector<16x1xf32> to vector<16x128xf32>
    %209 = arith.select %206, %208, %203 : vector<16x128xi1>, vector<16x128xf32>
    %c0_53 = arith.constant 0 : index
    %c0_54 = arith.constant 0 : index
    %210 = vector.load %arg14[%c0_53, %c0_54] : memref<16x128xf32, #tpu.memory_space<vmem>>, vector<16x128xf32>
    tpu.vector_store %arg14[%c0_53, %c0_54], %209 {strides = array<i32>} : memref<16x128xf32, #tpu.memory_space<vmem>>, vector<16x128xf32>,
    return
  }
  func.func @transform_0(%arg0: i32) -> (i32, i32) {
    %c0_i32 = arith.constant 0 : i32
    %c0_i32_0 = arith.constant 0 : i32
    return %arg0, %c0_i32 : i32, i32
  }
  func.func @transform_1(%arg0: i32) -> (i32, i32) {
    %c0_i32 = arith.constant 0 : i32
    %c0_i32_0 = arith.constant 0 : i32
    return %arg0, %c0_i32 : i32, i32
  }
  func.func @transform_2(%arg0: i32) -> (i32, i32) {
    %c0_i32 = arith.constant 0 : i32
    %c0_i32_0 = arith.constant 0 : i32
    %c0_i32_1 = arith.constant 0 : i32
    return %c0_i32, %c0_i32_0 : i32, i32
  }
  func.func @transform_3(%arg0: i32) -> (i32, i32) {
    %c0_i32 = arith.constant 0 : i32
    %c0_i32_0 = arith.constant 0 : i32
    %c0_i32_1 = arith.constant 0 : i32
    return %c0_i32, %c0_i32_0 : i32, i32
  }
  func.func @transform_4(%arg0: i32) -> (i32, i32) {
    %c0_i32 = arith.constant 0 : i32
    %c0_i32_0 = arith.constant 0 : i32
    %c0_i32_1 = arith.constant 0 : i32
    return %c0_i32, %c0_i32_0 : i32, i32
  }
  func.func @transform_5(%arg0: i32) -> (i32, i32) {
    %c0_i32 = arith.constant 0 : i32
    %c0_i32_0 = arith.constant 0 : i32
    %c0_i32_1 = arith.constant 0 : i32
    return %c0_i32, %c0_i32_0 : i32, i32
  }
  func.func @transform_6(%arg0: i32) -> (i32, i32) {
    %c0_i32 = arith.constant 0 : i32
    %c0_i32_0 = arith.constant 0 : i32
    %c0_i32_1 = arith.constant 0 : i32
    return %c0_i32, %c0_i32_0 : i32, i32
  }
  func.func @transform_7(%arg0: i32) -> (i32, i32) {
    %c0_i32 = arith.constant 0 : i32
    %c0_i32_0 = arith.constant 0 : i32
    %c0_i32_1 = arith.constant 0 : i32
    return %c0_i32, %c0_i32_0 : i32, i32
  }
  func.func @transform_8(%arg0: i32) -> (i32, i32) {
    %c0_i32 = arith.constant 0 : i32
    %c0_i32_0 = arith.constant 0 : i32
    %c0_i32_1 = arith.constant 0 : i32
    return %c0_i32, %c0_i32_0 : i32, i32
  }
  func.func @transform_9(%arg0: i32) -> (i32, i32) {
    %c0_i32 = arith.constant 0 : i32
    %c0_i32_0 = arith.constant 0 : i32
    %c0_i32_1 = arith.constant 0 : i32
    return %c0_i32, %c0_i32_0 : i32, i32
  }
  func.func @transform_10(%arg0: i32) -> (i32, i32) {
    %c0_i32 = arith.constant 0 : i32
    %c0_i32_0 = arith.constant 0 : i32
    %c0_i32_1 = arith.constant 0 : i32
    return %c0_i32, %c0_i32_0 : i32, i32
  }
  func.func @transform_11(%arg0: i32) -> (i32, i32) {
    %c0_i32 = arith.constant 0 : i32
    %c0_i32_0 = arith.constant 0 : i32
    %c0_i32_1 = arith.constant 0 : i32
    return %c0_i32, %c0_i32_0 : i32, i32
  }
  func.func @transform_12(%arg0: i32) -> (i32, i32) {
    %c0_i32 = arith.constant 0 : i32
    %c0_i32_0 = arith.constant 0 : i32
    %c0_i32_1 = arith.constant 0 : i32
    return %c0_i32, %c0_i32_0 : i32, i32
  }
  func.func @transform_13(%arg0: i32) -> (i32, i32) {
    %c0_i32 = arith.constant 0 : i32
    %c0_i32_0 = arith.constant 0 : i32
    return %arg0, %c0_i32 : i32, i32
  }
}

</mosaic_0001>

<bundles_post_ra>
// kernel: tpu_custom_call.1
= control target key start
LH: loop header
LB: loop body
LE: loop exit
PB: predicated region body
PF: predicated region fallthrough
CT: control target
= control target key end

     0   :  { %18 = vsyncpa [#allocation3], 0  ;;  %s2227_s0 = inlined_call_operand.vmem [shape: f32[16,8], index: 0, kind: input, shape index: {}]   ;;  %s2228_s1 = inlined_call_operand.vmem [shape: f32[16,8], index: 1, kind: input, shape index: {}]   ;;  %s2229_s2 = inlined_call_operand.hbm [shape: f32[8,128], index: 2, kind: input, shape index: {}]   ;;  %s2230_s3 = inlined_call_operand.vmem [shape: f32[32,128], index: 3, kind: input, shape index: {}]   ;;  %s2231_s4 = inlined_call_operand.vmem [shape: f32[1,128], index: 4, kind: input, shape index: {}]   ;;  %s2232_s5 = inlined_call_operand.vmem [shape: f32[32,32], index: 5, kind: input, shape index: {}]   ;;  %s2233_s6 = inlined_call_operand.vmem [shape: f32[1,32], index: 6, kind: input, shape index: {}]   ;;  %s2234_s7 = inlined_call_operand.vmem [shape: f32[32,16], index: 7, kind: input, shape index: {}]   ;;  %s2235_s8 = inlined_call_operand.vmem [shape: f32[1,16], index: 8, kind: input, shape index: {}]   ;;  %s2236_s9 = inlined_call_operand.vmem [shape: f32[8,48], index: 9, kind: input, shape index: {}]   ;;  %s2237_s10 = inlined_call_operand.vmem [shape: f32[1,48], index: 10, kind: input, shape index: {}]   ;;  %s2238_s11 = inlined_call_operand.vmem [shape: f32[48,128], index: 11, kind: input, shape index: {}]   ;;  %s2239_s12 = inlined_call_operand.vmem [shape: f32[1,128], index: 12, kind: input, shape index: {}]   ;;  %s2240_s13 = inlined_call_operand.hbm [shape: f32[16,128], index: 13, kind: output, shape index: {}]  }
   0x1   :  { %19 = vsyncpa [#allocation4], 0  ;;  %s1900_s25 = smov [#allocation2]   ;;  %s1852_s29 = scalar_lea.hbm %s2229_s2, 128 }
   0x2   :  { %s30_s26 = sshll.u32 %s1900_s25, 4  ;;  %p1853_p0 = scmp.ne.s32.totalorder %s2229_s2, %s1852_s29  ;;  %s31_s26 = int_to_ptr.vmem [resolvable:$true] %s30_s26 }
   0x3   :  { %p1856_p1 = scmp.lt.u32.totalorder %s1852_s29, %s2229_s2 }
   0x5   :  { %p1858_p2 = pnand %p1856_p1, %p1853_p0 }
   0x7   :  { %1861 = shalt.err (!%p1858_p2)
}
   0x8   :  { %s1862_s17 = scalar_lea.vmem %s31_s26, 128  ;;  %p1867_p4 = scmp.lt.s32.totalorder %s31_s26, %s31_s26 }
   0x9   :  { %p1863_p3 = scmp.ne.s32.totalorder %s31_s26, %s1862_s17  ;;  %p1868_p5 = scmp.lt.s32.totalorder %s1862_s17, %s1862_s17 }
   0xb   :  { %p1869_p6 = por %p1868_p5, %p1867_p4 }
   0xd   :  { %p1870_p7 = pnand %p1869_p6, %p1863_p3 }
   0xf   :  { %1873 = shalt.err (!%p1870_p7)
}
  0x10   :  { %33 = dma.hbm_to_vmem [thread:$0]  %s2229_s2, 128, %s31_s26, [#allocation3]  }
  0x11   :  { %1896 = dma.done.wait [#allocation3], 128  }
  0x12   :  { %1897 = vsyncadd [#allocation3], 4294967168  ;;  %v1901_v0 = vmov 0.0|0.0   ;;  %vm1902_vm0 = vmmov 0   ;;  %v1903_v1 = vmov 0.0   ;;  %vm67_vm1 = vcmask 64512  }
  0x13   :  { %1700 = vmatprep.subr.bf16.mxu0 %v1901_v0  ;;  %1583 = vmatprep.mubr.msk.f32.mxu0 %vm1902_vm0, %v1903_v1  ;;  %v59_v2 = vld [vmem:[#allocation2] sm:$0xff]  ;;  %v58_v4 = vld [vmem:[%s2227_s0 + $0x8] sm:$0xff]  ;;  %v151_v7 = vld [vmem:[%s2230_s3 + $0x10] sm:$0xff]  ;;  %s1904_s14 = smov 32   ;;  %vm153_vm2 = vcmask 261120   ;;  %vm996_vm3 = vcmask 1041408  }
  0x14   :  { %v57_v3 = vld [vmem:[%s2227_s0] sm:$0xff]  ;;  %1559 = vmatprep.subr.mxu1 %v59_v2  ;;  %v150_v6 = vld [vmem:[%s2230_s3 + $0x8] sm:$0xff]  ;;  %v152_v9 = vld [vmem:[%s2230_s3 + $0x18] sm:$0xff]  ;;  %vm998_vm4 = vcmask 1043456   ;;  %vm1000_vm5 = vcmask 1045504   ;;  %vm1355_vm6 = vcmask 392192  }
  0x15   :  { %1561 = vmatprep.mubr.msk.f32.mxu1 %vm67_vm1, %v57_v3  ;;  %v149_v5 = vld [vmem:[%s2230_s3] sm:$0xff]  ;;  %1560 = vmatpush3.msra.mxu1 %v59_v2  ;;  %v2019_v10 = vpack.c.bf16 %v152_v9, %v151_v7 }
  0x16   :  { %v2011_v8 = vpack.c.bf16 %v150_v6, %v149_v5  ;;  %1562 = vmatmul.mubr.msk.f32.vlgmr.msra.gmra.mrb[0].mxu1 %vm67_vm1, %v58_v4  ;;  %1694 = vmatprep.subr.bf16.mxu1 %v1901_v0  ;;  %v1461_v11 = vld [vmem:[%s2231_s4] ss:$0 sm:$0xff]  ;;  %s1905_s4 = smov 64  }
  0x17   :  { %1572 = vmatprep.mubr.msk.f32.mxu1 %vm1902_vm0, %v1903_v1 }
  0x18   :  { %1696 = vmatpush3.bf16.msra.mxu1 %v2011_v8  ;;  %1702 = vmatpush3.bf16.msra.mxu0 %v2011_v8 }
  0x19   :  { %1697 = vmatprep.subr.bf16.mxu1 %v1901_v0  ;;  %1703 = vmatprep.subr.bf16.mxu0 %v1901_v0 }
  0x1c   :  { %1699 = vmatpush3.bf16.msra.mxu1 %v2019_v10  ;;  %1705 = vmatpush3.bf16.msra.mxu0 %v2019_v10 }
  0x1d   :  { %1706 = vmatprep.subr.bf16.mxu1 %v1901_v0  ;;  %1712 = vmatprep.subr.bf16.mxu0 %v1901_v0 }
  0x1f   :  { %1573 = vmatmul.mubr.f32.vlgmr.msra.gmra.mrb[2].mxu1 %v1903_v1 }
  0x20   :  { %1708 = vmatpush3.bf16.msra.mxu1 %v2011_v8  ;;  %1594 = vmatprep.mubr.msk.f32.mxu1 %vm1902_vm0, %v1903_v1 }
  0x21   :  { %1709 = vmatprep.subr.bf16.mxu1 %v1901_v0 }
  0x24   :  { %1711 = vmatpush3.bf16.msra.mxu1 %v2019_v10 }
  0x25   :  { %1718 = vmatprep.subr.bf16.mxu1 %v1901_v0 }
  0xe9   :  { %v1563_v12 = vpop.f32.mrb[0].mxu1 }
  0xea   :  { %v2040_v13 = vadd.f32 %v1563_v12, %v1461_v11  ;;  %v140_v14 = vpop.f32.mrb[1].mxu1 }
  0xeb   :  { %v2042_v15 = vadd.f32 %v1461_v11, %v140_v14 }
  0xf2   :  { %v223_v16 = vpop.f32.mrb[2].mxu1 }
  0xf3   :  { %v227_v17 = vadd.f32 %v223_v16, %v2042_v15  ;;  %v1574_v18 = vpop.f32.mrb[3].mxu1 }
  0xf5   :  { %1780 = vtanh.f32 %v227_v17  ;;  %v1464_v20 = vmul.f32 -1.442695, %v227_v17 }
  0xf7   :  { %1782 = vpow2.f32 %v1464_v20 }
  0xff   :  { %v1781_v19 = vpop.eup %1780 }
 0x100   :  { %237 = vrot.lane.b32.xlu0 %v1781_v19, %s1904_s14 }
 0x101   :  { %v1783_v21 = vpop.eup %1782 }
 0x102   :  { %v231_v22 = vadd.f32 1.0, %v1783_v21 }
 0x104   :  { %1784 = vrcp.f32 %v231_v22 }
 0x10e   :  { %v1785_v23 = vpop.eup %1784 }
 0x10f   :  { %v235_v26 = vmul.f32 0.0, %v1785_v23 }
 0x172   :  { %v238_v24 = vpop.permute.xlu0 %237 }
 0x173   :  { %v240_v25 = vmul.f32 %v1785_v23, %v238_v24 }
 0x175   :  { %242 = vrot.lane.b32.xlu0 %v240_v25, %s1904_s14 }
 0x1e7   :  { %v243_v27 = vpop.permute.xlu0 %242 }
 0x1e8   :  { %v245_v28 = vadd.f32 %v243_v27, %v235_v26 }
 0x1ea   :  { %1786 = vtanh.f32 %v245_v28  ;;  %v339_v44 = vrot.slane %v245_v28, 6 }
 0x1f4   :  { %v1787_v29 = vpop.eup %1786 }
 0x1f5   :  { %248 = vrot.lane.b32.xlu1 %v1787_v29, %s1904_s14 }
 0x267   :  { %v249_v30 = vpop.permute.xlu1 %248 }
 0x268   :  { %v2048_v31 = vmul.f32 %v1785_v23, %v249_v30 }
 0x26a   :  { %253 = vrot.lane.b32.xlu1 %v2048_v31, %s1905_s4 }
 0x2dc   :  { %v254_v32 = vpop.permute.xlu1 %253 }
 0x2dd   :  { %1584 = vmatmul.mubr.msk.f32.vlgmr.msra.gmra.mrb[0].mxu0 %vm153_vm2, %v254_v32 }
 0x2de   :  { %1714 = vmatpush3.bf16.msra.mxu0 %v2011_v8  ;;  %1605 = vmatprep.mubr.msk.f32.mxu0 %vm1902_vm0, %v1903_v1 }
 0x2df   :  { %1715 = vmatprep.subr.bf16.mxu0 %v1901_v0 }
 0x2e2   :  { %1717 = vmatpush3.bf16.msra.mxu0 %v2019_v10 }
 0x2e3   :  { %1724 = vmatprep.subr.bf16.mxu0 %v1901_v0 }
 0x3b0   :  { %v323_v33 = vpop.f32.mrb[0].mxu0 }
 0x3b1   :  { %v328_v34 = vrot.slane %v323_v33, 6  ;;  %v1585_v35 = vpop.f32.mrb[1].mxu0 }
 0x3b3   :  { %v330_v36 = vadd.f32 %v328_v34, %v2042_v15 }
 0x3b5   :  { %1788 = vtanh.f32 %v330_v36  ;;  %v1466_v38 = vmul.f32 -1.442695, %v330_v36 }
 0x3b7   :  { %1790 = vpow2.f32 %v1466_v38 }
 0x3bf   :  { %v1789_v37 = vpop.eup %1788 }
 0x3c0   :  { %343 = vrot.lane.b32.xlu0 %v1789_v37, %s1904_s14 }
 0x3c1   :  { %v1791_v39 = vpop.eup %1790 }
 0x3c2   :  { %v334_v40 = vadd.f32 1.0, %v1791_v39 }
 0x3c4   :  { %1792 = vrcp.f32 %v334_v40 }
 0x3ce   :  { %v1793_v41 = vpop.eup %1792 }
 0x3cf   :  { %v341_v45 = vmul.f32 %v1793_v41, %v339_v44 }
 0x432   :  { %v344_v42 = vpop.permute.xlu0 %343 }
 0x433   :  { %v346_v43 = vmul.f32 %v1793_v41, %v344_v42 }
 0x435   :  { %348 = vrot.lane.b32.xlu1 %v346_v43, %s1904_s14 }
 0x4a7   :  { %v349_v46 = vpop.permute.xlu1 %348 }
 0x4a8   :  { %v351_v47 = vadd.f32 %v349_v46, %v341_v45 }
 0x4aa   :  { %1794 = vtanh.f32 %v351_v47  ;;  %v446_v2 = vrot.slane %v351_v47, 6 }
 0x4b4   :  { %v1795_v48 = vpop.eup %1794 }
 0x4b5   :  { %354 = vrot.lane.b32.xlu0 %v1795_v48, %s1904_s14 }
 0x527   :  { %v355_v49 = vpop.permute.xlu0 %354 }
 0x528   :  { %v357_v50 = vmul.f32 %v1793_v41, %v355_v49 }
 0x52a   :  { %v359_v51 = vrot.slane %v357_v50, 2  ;;  %v997_v11 = vsel %vm996_vm3, %v2048_v31, %v357_v50 }
 0x52c   :  { %360 = vrot.lane.b32.xlu1 %v359_v51, %s1905_s4 }
 0x59e   :  { %v361_v52 = vpop.permute.xlu1 %360 }
 0x59f   :  { %1595 = vmatmul.mubr.msk.f32.vlgmr.msra.gmra.mrb[4].mxu1 %vm153_vm2, %v361_v52 }
 0x5a0   :  { %1720 = vmatpush3.bf16.msra.mxu1 %v2011_v8  ;;  %1616 = vmatprep.mubr.msk.f32.mxu1 %vm1902_vm0, %v1903_v1 }
 0x5a1   :  { %1721 = vmatprep.subr.bf16.mxu1 %v1901_v0 }
 0x5a4   :  { %1723 = vmatpush3.bf16.msra.mxu1 %v2019_v10 }
 0x5a5   :  { %1730 = vmatprep.subr.bf16.mxu1 %v1901_v0 }
 0x672   :  { %v430_v53 = vpop.f32.mrb[4].mxu1 }
 0x673   :  { %v435_v54 = vrot.slane %v430_v53, 4  ;;  %v1596_v55 = vpop.f32.mrb[5].mxu1 }
 0x675   :  { %v437_v56 = vadd.f32 %v435_v54, %v2042_v15 }
 0x677   :  { %1796 = vtanh.f32 %v437_v56  ;;  %v1468_v58 = vmul.f32 -1.442695, %v437_v56 }
 0x679   :  { %1798 = vpow2.f32 %v1468_v58 }
 0x681   :  { %v1797_v57 = vpop.eup %1796 }
 0x682   :  { %450 = vrot.lane.b32.xlu0 %v1797_v57, %s1904_s14 }
 0x683   :  { %v1799_v59 = vpop.eup %1798 }
 0x684   :  { %v441_v60 = vadd.f32 1.0, %v1799_v59 }
 0x686   :  { %1800 = vrcp.f32 %v441_v60 }
 0x690   :  { %v1801_v61 = vpop.eup %1800 }
 0x691   :  { %v448_v3 = vmul.f32 %v1801_v61, %v446_v2 }
 0x6f4   :  { %v451_v62 = vpop.permute.xlu0 %450 }
 0x6f5   :  { %v453_v63 = vmul.f32 %v1801_v61, %v451_v62 }
 0x6f7   :  { %455 = vrot.lane.b32.xlu1 %v453_v63, %s1904_s14 }
 0x769   :  { %v456_v4 = vpop.permute.xlu1 %455 }
 0x76a   :  { %v458_v5 = vadd.f32 %v456_v4, %v448_v3 }
 0x76c   :  { %1802 = vtanh.f32 %v458_v5  ;;  %v553_v28 = vrot.slane %v458_v5, 6 }
 0x776   :  { %v1803_v6 = vpop.eup %1802 }
 0x777   :  { %461 = vrot.lane.b32.xlu0 %v1803_v6, %s1904_s14 }
 0x7e9   :  { %v462_v7 = vpop.permute.xlu0 %461 }
 0x7ea   :  { %v464_v9 = vmul.f32 %v1801_v61, %v462_v7 }
 0x7ec   :  { %v466_v12 = vrot.slane %v464_v9, 4  ;;  %v999_v14 = vsel %vm998_vm4, %v997_v11, %v464_v9 }
 0x7ee   :  { %467 = vrot.lane.b32.xlu1 %v466_v12, %s1905_s4 }
 0x860   :  { %v468_v16 = vpop.permute.xlu1 %467 }
 0x861   :  { %1606 = vmatmul.mubr.msk.f32.vlgmr.msra.gmra.mrb[2].mxu0 %vm153_vm2, %v468_v16 }
 0x862   :  { %1726 = vmatpush3.bf16.msra.mxu0 %v2011_v8  ;;  %1627 = vmatprep.mubr.msk.f32.mxu0 %vm1902_vm0, %v1903_v1 }
 0x863   :  { %1727 = vmatprep.subr.bf16.mxu0 %v1901_v0 }
 0x866   :  { %1729 = vmatpush3.bf16.msra.mxu0 %v2019_v10 }
 0x867   :  { %1736 = vmatprep.subr.bf16.mxu0 %v1901_v0 }
 0x934   :  { %v537_v17 = vpop.f32.mrb[2].mxu0 }
 0x935   :  { %v542_v18 = vrot.slane %v537_v17, 2  ;;  %v1607_v19 = vpop.f32.mrb[3].mxu0 }
 0x937   :  { %v544_v20 = vadd.f32 %v542_v18, %v2042_v15 }
 0x939   :  { %1804 = vtanh.f32 %v544_v20  ;;  %v1470_v22 = vmul.f32 -1.442695, %v544_v20 }
 0x93b   :  { %1806 = vpow2.f32 %v1470_v22 }
 0x943   :  { %v1805_v21 = vpop.eup %1804 }
 0x944   :  { %557 = vrot.lane.b32.xlu0 %v1805_v21, %s1904_s14 }
 0x945   :  { %v1807_v23 = vpop.eup %1806 }
 0x946   :  { %v548_v24 = vadd.f32 1.0, %v1807_v23 }
 0x948   :  { %1808 = vrcp.f32 %v548_v24 }
 0x952   :  { %v1809_v25 = vpop.eup %1808 }
 0x953   :  { %v555_v29 = vmul.f32 %v1809_v25, %v553_v28 }
 0x9b6   :  { %v558_v26 = vpop.permute.xlu0 %557 }
 0x9b7   :  { %v560_v27 = vmul.f32 %v1809_v25, %v558_v26 }
 0x9b9   :  { %562 = vrot.lane.b32.xlu1 %v560_v27, %s1904_s14 }
 0xa2b   :  { %v563_v30 = vpop.permute.xlu1 %562 }
 0xa2c   :  { %v565_v31 = vadd.f32 %v563_v30, %v555_v29 }
 0xa2e   :  { %1810 = vtanh.f32 %v565_v31  ;;  %v657_v47 = vrot.slane %v565_v31, 6 }
 0xa38   :  { %v1811_v15 = vpop.eup %1810 }
 0xa39   :  { %568 = vrot.lane.b32.xlu0 %v1811_v15, %s1904_s14 }
 0xaab   :  { %v569_v32 = vpop.permute.xlu0 %568 }
 0xaac   :  { %v571_v33 = vmul.f32 %v1809_v25, %v569_v32 }
 0xaae   :  { %v573_v34 = vrot.slane %v571_v33, 6  ;;  %v2091_v35 = vsel %vm1000_vm5, %v999_v14, %v571_v33 }
 0xab0   :  { %574 = vrot.lane.b32.xlu1 %v573_v34, %s1905_s4 }
 0xb22   :  { %v575_v36 = vpop.permute.xlu1 %574 }
 0xb23   :  { %1617 = vmatmul.mubr.msk.f32.vlgmr.msra.gmra.mrb[6].mxu1 %vm153_vm2, %v575_v36 }
 0xb24   :  { %1732 = vmatpush3.bf16.msra.mxu1 %v2011_v8  ;;  %1638 = vmatprep.mubr.msk.f32.mxu1 %vm1902_vm0, %v1903_v1 }
 0xb25   :  { %1733 = vmatprep.subr.bf16.mxu1 %v1901_v0 }
 0xb28   :  { %1735 = vmatpush3.bf16.msra.mxu1 %v2019_v10 }
 0xbf6   :  { %v644_v37 = vpop.f32.mrb[6].mxu1 }
 0xbf7   :  { %v648_v38 = vadd.f32 %v644_v37, %v2040_v13  ;;  %v1618_v39 = vpop.f32.mrb[7].mxu1 }
 0xbf9   :  { %1812 = vtanh.f32 %v648_v38  ;;  %v1472_v41 = vmul.f32 -1.442695, %v648_v38 }
 0xbfb   :  { %1814 = vpow2.f32 %v1472_v41 }
 0xc03   :  { %v1813_v40 = vpop.eup %1812 }
 0xc04   :  { %661 = vrot.lane.b32.xlu0 %v1813_v40, %s1904_s14 }
 0xc05   :  { %v1815_v42 = vpop.eup %1814 }
 0xc06   :  { %v652_v43 = vadd.f32 1.0, %v1815_v42 }
 0xc08   :  { %1816 = vrcp.f32 %v652_v43 }
 0xc12   :  { %v1817_v44 = vpop.eup %1816 }
 0xc13   :  { %v659_v48 = vmul.f32 %v1817_v44, %v657_v47 }
 0xc76   :  { %v662_v45 = vpop.permute.xlu0 %661 }
 0xc77   :  { %v664_v46 = vmul.f32 %v1817_v44, %v662_v45 }
 0xc79   :  { %666 = vrot.lane.b32.xlu1 %v664_v46, %s1904_s14 }
 0xceb   :  { %v667_v49 = vpop.permute.xlu1 %666 }
 0xcec   :  { %v669_v50 = vadd.f32 %v667_v49, %v659_v48 }
 0xcee   :  { %1818 = vtanh.f32 %v669_v50 }
 0xcf8   :  { %v1819_v51 = vpop.eup %1818 }
 0xcf9   :  { %672 = vrot.lane.b32.xlu0 %v1819_v51, %s1904_s14  ;;  %v1006_v51 = vld [vmem:[%s2232_s5 + $0x8] sm:$0xff] }
 0xd6b   :  { %v673_v52 = vpop.permute.xlu0 %672 }
 0xd6c   :  { %v2104_v53 = vmul.f32 %v1817_v44, %v673_v52  ;;  %v1007_v52 = vld [vmem:[%s2232_s5 + $0x10] sm:$0xff] }
 0xd6e   :  { %677 = vrot.lane.b32.xlu1 %v2104_v53, %s1905_s4 }
 0xde0   :  { %v678_v54 = vpop.permute.xlu1 %677 }
 0xde1   :  { %1628 = vmatmul.mubr.msk.f32.vlgmr.msra.gmra.mrb[4].mxu0 %vm153_vm2, %v678_v54 }
 0xde2   :  { %1738 = vmatpush3.bf16.msra.mxu0 %v2011_v8  ;;  %1649 = vmatprep.mubr.msk.f32.mxu0 %vm1902_vm0, %v1903_v1 }
 0xde3   :  { %1739 = vmatprep.subr.bf16.mxu0 %v1901_v0  ;;  %v763_v0 = vrot.slane %v669_v50, 6  ;;  %v1005_v50 = vld [vmem:[%s2232_s5] sm:$0xff] }
 0xde6   :  { %1741 = vmatpush3.bf16.msra.mxu0 %v2019_v10 }
 0xeb4   :  { %v747_v55 = vpop.f32.mrb[4].mxu0 }
 0xeb5   :  { %v752_v56 = vrot.slane %v747_v55, 6  ;;  %v1629_v57 = vpop.f32.mrb[5].mxu0 }
 0xeb6   :  { %v1104_v57 = vld [vmem:[%s2234_s7 + $0x8] sm:$0xff] }
 0xeb7   :  { %v754_v58 = vadd.f32 %v752_v56, %v2040_v13  ;;  %v1103_v56 = vld [vmem:[%s2234_s7] sm:$0xff] }
 0xeb9   :  { %1820 = vtanh.f32 %v754_v58  ;;  %v1474_v60 = vmul.f32 -1.442695, %v754_v58  ;;  %v1750_v58 = vpack.c.bf16 %v1104_v57, %v1103_v56  ;;  %v1487_v56 = vld [vmem:[%s2237_s10] ss:$0 sm:$0xff]  ;;  %s1908_s10 = smov [#allocation5]  }
 0xeba   :  { %s1449_s29 = sshll.u32 %s1908_s10, 4  ;;  %s1450_s29 = int_to_ptr.vmem [resolvable:$true] %s1449_s29 }
 0xebb   :  { %1822 = vpow2.f32 %v1474_v60  ;;  %1751 = vmatprep.subr.bf16.mxu0 %v1750_v58  ;;  %s1874_s0 = scalar_lea.vmem %s1450_s29, 256  ;;  %p1879_p9 = scmp.lt.s32.totalorder %s1450_s29, %s1450_s29 }
 0xebc   :  { %p1875_p8 = scmp.ne.s32.totalorder %s1450_s29, %s1874_s0  ;;  %p1880_p10 = scmp.lt.s32.totalorder %s1874_s0, %s1874_s0 }
 0xebe   :  { %p1881_p11 = por %p1880_p10, %p1879_p9 }
 0xec0   :  { %p1882_p12 = pnand %p1881_p11, %p1875_p8 }
 0xec3   :  { %v1821_v59 = vpop.eup %1820 }
 0xec4   :  { %767 = vrot.lane.b32.xlu0 %v1821_v59, %s1904_s14 }
 0xec5   :  { %v1823_v61 = vpop.eup %1822 }
 0xec6   :  { %v758_v8 = vadd.f32 1.0, %v1823_v61 }
 0xec8   :  { %1824 = vrcp.f32 %v758_v8 }
 0xed2   :  { %v1825_v62 = vpop.eup %1824 }
 0xed3   :  { %v765_v10 = vmul.f32 %v1825_v62, %v763_v0  ;;  %v1479_v0 = vld [vmem:[%s2233_s6] ss:$0 sm:$0xff] }
 0xf36   :  { %v768_v1 = vpop.permute.xlu0 %767 }
 0xf37   :  { %v770_v63 = vmul.f32 %v1825_v62, %v768_v1  ;;  %v1106_v1 = vld [vmem:[%s2234_s7 + $0x18] sm:$0xff] }
 0xf39   :  { %772 = vrot.lane.b32.xlu1 %v770_v63, %s1904_s14 }
 0xfab   :  { %v773_v2 = vpop.permute.xlu1 %772 }
 0xfac   :  { %v775_v3 = vadd.f32 %v773_v2, %v765_v10 }
 0xfae   :  { %1826 = vtanh.f32 %v775_v3  ;;  %v870_v24 = vrot.slane %v775_v3, 6 }
 0xfb8   :  { %v1827_v4 = vpop.eup %1826 }
 0xfb9   :  { %778 = vrot.lane.b32.xlu0 %v1827_v4, %s1904_s14 }
0x102b   :  { %v779_v5 = vpop.permute.xlu0 %778 }
0x102c   :  { %v781_v6 = vmul.f32 %v1825_v62, %v779_v5  ;;  %v1105_v62 = vld [vmem:[%s2234_s7 + $0x10] sm:$0xff] }
0x102d   :  { %v1754_v63 = vpack.c.bf16 %v1106_v1, %v1105_v62  ;;  %v1437_v62 = vlaneseq }
0x102e   :  { %v783_v7 = vrot.slane %v781_v6, 2  ;;  %v1002_v31 = vsel %vm996_vm3, %v2104_v53, %v781_v6  ;;  %v1008_v53 = vld [vmem:[%s2232_s5 + $0x18] sm:$0xff] }
0x102f   :  { %v1746_v54 = vpack.c.bf16 %v1008_v53, %v1007_v52  ;;  %v1438_v1 = vand.u32 127, %v1437_v62 }
0x1030   :  { %784 = vrot.lane.b32.xlu1 %v783_v7, %s1905_s4  ;;  %v1482_v7 = vld [vmem:[%s2235_s8] ss:$0 sm:$0xff]  ;;  %s1907_s8 = smov 8  }
0x1031   :  { %vm1439_vm7 = vcmp.eq.s32.totalorder %v1438_v1, 12 }
0x10a2   :  { %v785_v9 = vpop.permute.xlu1 %784 }
0x10a3   :  { %1639 = vmatmul.mubr.msk.f32.vlgmr.msra.gmra.mrb[8].mxu1 %vm153_vm2, %v785_v9 }
0x1176   :  { %v854_v11 = vpop.f32.mrb[8].mxu1 }
0x1177   :  { %v859_v12 = vrot.slane %v854_v11, 4  ;;  %v1640_v14 = vpop.f32.mrb[9].mxu1 }
0x1179   :  { %v861_v16 = vadd.f32 %v859_v12, %v2040_v13 }
0x117b   :  { %1828 = vtanh.f32 %v861_v16  ;;  %v1476_v18 = vmul.f32 -1.442695, %v861_v16 }
0x117d   :  { %1830 = vpow2.f32 %v1476_v18 }
0x1185   :  { %v1829_v17 = vpop.eup %1828 }
0x1186   :  { %874 = vrot.lane.b32.xlu0 %v1829_v17, %s1904_s14 }
0x1187   :  { %v1831_v19 = vpop.eup %1830 }
0x1188   :  { %v865_v20 = vadd.f32 1.0, %v1831_v19 }
0x118a   :  { %1832 = vrcp.f32 %v865_v20  ;;  %v1251_v20 = vld [vmem:[%s2236_s9] sm:$0xff] }
0x1194   :  { %v1833_v21 = vpop.eup %1832 }
0x1195   :  { %v872_v25 = vmul.f32 %v1833_v21, %v870_v24 }
0x11f8   :  { %v875_v22 = vpop.permute.xlu0 %874 }
0x11f9   :  { %v877_v23 = vmul.f32 %v1833_v21, %v875_v22 }
0x11fb   :  { %879 = vrot.lane.b32.xlu1 %v877_v23, %s1904_s14 }
0x126d   :  { %v880_v26 = vpop.permute.xlu1 %879 }
0x126e   :  { %v882_v27 = vadd.f32 %v880_v26, %v872_v25 }
0x1270   :  { %1834 = vtanh.f32 %v882_v27  ;;  %v977_v46 = vrot.slane %v882_v27, 6  ;;  %v1202_v27 = vld [vmem:[%s2228_s1 + $0x8] sm:$0xff] }
0x127a   :  { %v1835_v28 = vpop.eup %1834 }
0x127b   :  { %885 = vrot.lane.b32.xlu0 %v1835_v28, %s1904_s14  ;;  %v1201_v28 = vld [vmem:[%s2228_s1] sm:$0xff] }
0x12ed   :  { %v886_v29 = vpop.permute.xlu0 %885 }
0x12ee   :  { %v888_v30 = vmul.f32 %v1833_v21, %v886_v29 }
0x12f0   :  { %v890_v15 = vrot.slane %v888_v30, 4  ;;  %v1003_v32 = vsel %vm998_vm4, %v1002_v31, %v888_v30  ;;  %v1342_v30 = vld [vmem:[%s2238_s11] sm:$0xff]  ;;  %v1343_v31 = vld [vmem:[%s2238_s11 + $0x8] sm:$0xff] }
0x12f2   :  { %891 = vrot.lane.b32.xlu1 %v890_v15, %s1905_s4  ;;  %v1344_v15 = vld [vmem:[%s2238_s11 + $0x10] sm:$0xff] }
0x1364   :  { %v892_v33 = vpop.permute.xlu1 %891 }
0x1365   :  { %1650 = vmatmul.mubr.msk.f32.vlgmr.msra.gmra.mrb[6].mxu0 %vm153_vm2, %v892_v33 }
0x1366   :  { %1753 = vmatpush3.bf16.msra.mxu0 %v1750_v58 }
0x1367   :  { %1755 = vmatprep.subr.bf16.mxu0 %v1754_v63 }
0x136a   :  { %1757 = vmatpush3.bf16.msra.mxu0 %v1754_v63 }
0x1438   :  { %v961_v34 = vpop.f32.mrb[6].mxu0 }
0x1439   :  { %v966_v36 = vrot.slane %v961_v34, 2  ;;  %v1651_v37 = vpop.f32.mrb[7].mxu0  ;;  %v1758_v34 = vpack.c.bf16 %v1343_v31, %v1342_v30 }
0x143b   :  { %v968_v38 = vadd.f32 %v966_v36, %v2040_v13  ;;  %v1345_v36 = vld [vmem:[%s2238_s11 + $0x18] sm:$0xff]  ;;  %1759 = vmatprep.subr.bf16.mxu0 %v1758_v34 }
0x143d   :  { %1836 = vtanh.f32 %v968_v38  ;;  %v1478_v40 = vmul.f32 -1.442695, %v968_v38  ;;  %v1762_v38 = vpack.c.bf16 %v1345_v36, %v1344_v15 }
0x143f   :  { %1838 = vpow2.f32 %v1478_v40 }
0x1447   :  { %v1837_v39 = vpop.eup %1836 }
0x1448   :  { %981 = vrot.lane.b32.xlu0 %v1837_v39, %s1904_s14 }
0x1449   :  { %v1839_v41 = vpop.eup %1838 }
0x144a   :  { %v972_v42 = vadd.f32 1.0, %v1839_v41 }
0x144c   :  { %1840 = vrcp.f32 %v972_v42 }
0x1456   :  { %v1841_v43 = vpop.eup %1840 }
0x1457   :  { %v979_v47 = vmul.f32 %v1841_v43, %v977_v46 }
0x14ba   :  { %v982_v44 = vpop.permute.xlu0 %981 }
0x14bb   :  { %v984_v45 = vmul.f32 %v1841_v43, %v982_v44 }
0x14bd   :  { %986 = vrot.lane.b32.xlu1 %v984_v45, %s1904_s14 }
0x14c1   :  { %1018 = vrot.lane.b32.xlu1 %v2091_v35, %s1905_s4  ;;  %v1742_v35 = vpack.c.bf16 %v1006_v51, %v1005_v50  ;;  %v1346_v50 = vld [vmem:[%s2238_s11 + $0x20] sm:$0xff]  ;;  %v1347_v51 = vld [vmem:[%s2238_s11 + $0x28] sm:$0xff] }
0x14c2   :  { %v1766_v52 = vpack.c.bf16 %v1347_v51, %v1346_v50 }
0x14c3   :  { %1743 = vmatprep.subr.bf16.mxu1 %v1742_v35 }
0x14c4   :  { %1745 = vmatpush3.bf16.msra.mxu1 %v1742_v35 }
0x14c5   :  { %1747 = vmatprep.subr.bf16.mxu1 %v1746_v54 }
0x14c8   :  { %1749 = vmatpush3.bf16.msra.mxu1 %v1746_v54 }
0x14c9   :  { %1674 = vmatprep.subr.mxu1 %v1251_v20 }
0x152f   :  { %v987_v13 = vpop.permute.xlu1 %986 }
0x1530   :  { %v989_v48 = vadd.f32 %v987_v13, %v979_v47 }
0x1532   :  { %1842 = vtanh.f32 %v989_v48 }
0x1533   :  { %v1019_v49 = vpop.permute.xlu1 %1018 }
0x1534   :  { %1660 = vmatprep.mubr.msk.f32.mxu1 %vm153_vm2, %v1019_v49 }
0x153c   :  { %v1843_v55 = vpop.eup %1842 }
0x153d   :  { %992 = vrot.lane.b32.xlu0 %v1843_v55, %s1904_s14  ;;  %s1906_s14 = smov 120  }
0x15af   :  { %v993_v59 = vpop.permute.xlu0 %992 }
0x15b0   :  { %v995_v60 = vmul.f32 %v1841_v43, %v993_v59 }
0x15b2   :  { %v1004_v61 = vsel %vm1000_vm5, %v1003_v32, %v995_v60 }
0x15b3   :  { %1020 = vrot.lane.b32.xlu0 %v1004_v61, %s1905_s4 }
0x1625   :  { %v1021_v8 = vpop.permute.xlu0 %1020 }
0x1626   :  { %1661 = vmatmul.mubr.msk.f32.vlgmr.msra.gmra.mrb[10].mxu1 %vm153_vm2, %v1021_v8 }
0x1627   :  { %1675 = vmatpush3.msra.mxu1 %v1251_v20 }
0x16f9   :  { %v1662_v10 = vpop.f32.mrb[10].mxu1 }
0x16fa   :  { %v1098_v2 = vadd.f32 %v1662_v10, %v1479_v0  ;;  %v1092_v3 = vpop.f32.mrb[11].mxu1 }
0x16fb   :  { %v1093_v4 = vadd.f32 %v1479_v0, %v1092_v3  ;;  %v1490_v0 = vld [vmem:[%s2239_s12] ss:$0 sm:$0xff] }
0x16fc   :  { %v1102_v6 = vmax.f32 %v1098_v2, 0.0 }
0x16fd   :  { %v1101_v5 = vmax.f32 %v1093_v4, 0.0 }
0x16ff   :  { %1671 = vmatprep.mubr.msk.f32.mxu0 %vm153_vm2, %v1101_v5 }
0x1700   :  { %1672 = vmatmul.mubr.msk.f32.vlgmr.msra.gmra.mrb[8].mxu0 %vm153_vm2, %v1102_v6 }
0x1701   :  { %1761 = vmatpush3.bf16.msra.mxu0 %v1758_v34 }
0x1702   :  { %1763 = vmatprep.subr.bf16.mxu0 %v1762_v38 }
0x1705   :  { %1765 = vmatpush3.bf16.msra.mxu0 %v1762_v38 }
0x1706   :  { %1767 = vmatprep.subr.bf16.mxu0 %v1766_v52 }
0x1709   :  { %1769 = vmatpush3.bf16.msra.mxu0 %v1766_v52 }
0x17d3   :  { %v1673_v9 = vpop.f32.mrb[8].mxu0 }
0x17d4   :  { %v1192_v11 = vadd.f32 %v1673_v9, %v1482_v7  ;;  %v1186_v12 = vpop.f32.mrb[9].mxu0 }
0x17d5   :  { %v1187_v14 = vadd.f32 %v1482_v7, %v1186_v12 }
0x17d6   :  { %v1196_v16 = vmul.f32 0.5, %v1192_v11  ;;  %v1220_v23 = vmul.f32 %v1192_v11, %v1192_v11  ;;  %v1217_v25 = vmul.f32 1.442695, %v1192_v11 }
0x17d7   :  { %v1195_v17 = vmul.f32 0.5, %v1187_v14  ;;  %v1219_v24 = vmul.f32 %v1187_v14, %v1187_v14  ;;  %v1215_v26 = vmul.f32 1.442695, %v1187_v14 }
0x17d8   :  { %v1199_v18 = vmul.f32 1.442695, %v1196_v16 }
0x17d9   :  { %v1197_v19 = vmul.f32 1.442695, %v1195_v17 }
0x17da   :  { %1844 = vpow2.f32 %v1199_v18 }
0x17db   :  { %1846 = vpow2.f32 %v1197_v19 }
0x17dc   :  { %1848 = vpow2.f32 %v1217_v25 }
0x17dd   :  { %1850 = vpow2.f32 %v1215_v26 }
0x17e4   :  { %v1845_v21 = vpop.eup %1844 }
0x17e5   :  { %v1847_v22 = vpop.eup %1846  ;;  %1207 = vrot.lane.b32.xlu0 %v1845_v21, %s1906_s14 }
0x17e6   :  { %1205 = vrot.lane.b32.xlu1 %v1847_v22, %s1906_s14  ;;  %v1849_v39 = vpop.eup %1848 }
0x17e7   :  { %v1851_v42 = vpop.eup %1850 }
0x17e9   :  { %1225 = vrot.lane.b32.xlu0 %v1220_v23, %s1907_s8 }
0x17ea   :  { %1223 = vrot.lane.b32.xlu1 %v1219_v24, %s1907_s8 }
0x1857   :  { %v1208_v29 = vpop.permute.xlu0 %1207 }
0x1858   :  { %v1212_v32 = vmul.f32 %v1208_v29, %v1202_v27  ;;  %v1206_v33 = vpop.permute.xlu1 %1205 }
0x1859   :  { %v1211_v37 = vmul.f32 %v1206_v33, %v1201_v28 }
0x185a   :  { %v1214_v43 = vadd.f32 %v1212_v32, %v1192_v11 }
0x185b   :  { %v1213_v40 = vadd.f32 %v1211_v37, %v1187_v14  ;;  %v1226_v41 = vpop.permute.xlu0 %1225 }
0x185c   :  { %v1230_v44 = vadd.f32 %v1849_v39, %v1226_v41  ;;  %v1224_v45 = vpop.permute.xlu1 %1223 }
0x185d   :  { %v1229_v46 = vadd.f32 %v1851_v42, %v1224_v45  ;;  %1676 = vmatprep.mubr.msk.f32.mxu1 %vm67_vm1, %v1213_v40 }
0x185e   :  { %v1232_v47 = vsub.f32 %v1230_v44, %v1192_v11  ;;  %1677 = vmatmul.mubr.msk.f32.vlgmr.msra.gmra.mrb[12].mxu1 %vm67_vm1, %v1214_v43 }
0x185f   :  { %v1231_v13 = vsub.f32 %v1229_v46, %v1187_v14 }
0x1860   :  { %v1486_v48 = vadd.f32 -1.0, %v1232_v47 }
0x1861   :  { %v1485_v49 = vadd.f32 -1.0, %v1231_v13 }
0x1862   :  { %1239 = vrot.lane.b32.xlu0 %v1486_v48, %s1906_s14 }
0x1863   :  { %1237 = vrot.lane.b32.xlu1 %v1485_v49, %s1906_s14 }
0x18d4   :  { %v1240_v35 = vpop.permute.xlu0 %1239 }
0x18d5   :  { %v1238_v53 = vpop.permute.xlu1 %1237  ;;  %v1246_v54 = vsel %vm67_vm1, %v1240_v35, 0.0 }
0x18d6   :  { %1247 = vadd.xlane.f32.xlu0 %v1246_v54  ;;  %v1243_v55 = vsel %vm67_vm1, %v1238_v53, 0.0 }
0x18d7   :  { %1244 = vadd.xlane.f32.xlu1 %v1243_v55 }
0x1931   :  { %v1678_v57 = vpop.f32.mrb[12].mxu1 }
0x1932   :  { %v1337_v58 = vadd.f32 %v1678_v57, %v1487_v56  ;;  %v1331_v59 = vpop.f32.mrb[13].mxu1 }
0x1933   :  { %v1332_v60 = vadd.f32 %v1487_v56, %v1331_v59 }
0x1934   :  { %v1341_v8 = vmax.f32 %v1337_v58, 0.0 }
0x1935   :  { %v1340_v61 = vmax.f32 %v1332_v60, 0.0 }
0x1937   :  { %1691 = vmatprep.mubr.msk.f32.mxu0 %vm1355_vm6, %v1340_v61 }
0x1938   :  { %1692 = vmatmul.mubr.msk.f32.vlgmr.msra.gmra.mrb[10].mxu0 %vm1355_vm6, %v1341_v8 }
0x1963   :  { %v1248_v63 = vpop.xlane.xlu0 %1247 }
0x1964   :  { %v1245_v10 = vpop.xlane.xlu1 %1244  ;;  %v1250_v3 = vmul.f32 0.5, %v1248_v63 }
0x1965   :  { %v1249_v6 = vmul.f32 0.5, %v1245_v10 }
0x1a0b   :  { %v1693_v2 = vpop.f32.mrb[10].mxu0 }
0x1a0c   :  { %v1434_v4 = vadd.f32 %v1693_v2, %v1490_v0  ;;  %v1428_v5 = vpop.f32.mrb[11].mxu0 }
0x1a0d   :  { %v1429_v7 = vadd.f32 %v1490_v0, %v1428_v5 }
0x1a0e   :  { %v1441_v9 = vsel %vm1439_vm7, %v1250_v3, %v1434_v4 }
0x1a0f   :  { %1443 = vst [vmem:[#allocation5 + $0x8] sm:$0xff] %v1441_v9  ;;  %v1440_v11 = vsel %vm1439_vm7, %v1249_v6, %v1429_v7 }
0x1a10   :  { %1442 = vst [vmem:[#allocation5] sm:$0xff] %v1440_v11 }
0x1a11   :  { %1885 = shalt.err (!%p1882_p12)
}
0x1a12   :  { %s1886_s30 = scalar_lea.hbm %s2240_s13, 256 }
0x1a13   :  { %p1887_p13 = scmp.ne.s32.totalorder %s2240_s13, %s1886_s30  ;;  %p1890_p0 = scmp.lt.u32.totalorder %s1886_s30, %s2240_s13 }
0x1a15   :  { %p1892_p1 = pnand %p1890_p0, %p1887_p13 }
0x1a17   :  { %1895 = shalt.err (!%p1892_p1)
}
0x1a18   :  { %s1909_s4 = smov 128  }
0x1a19   :  { %1455 = dma.vmem_to_hbm [thread:$0]  %s1450_s29, 256, %s2240_s13, [#allocation4], %s1909_s4, %s1909_s4, %s1907_s8  }
0x1a1a   :  { %1898 = dma.done.wait [#allocation4], 256  }
0x1a1b   :  { %1899 = vsyncadd [#allocation4], 4294967040 }
0x1a1c   :  { %1459 = vsyncpa [#allocation3], 1 }
0x1a1d   :  { %1460 = vsyncpa [#allocation4], 1 }

</bundles_post_ra>
